<compile_context>
chip_gen: v7x
topology: tpu7x:2x2x1
jax: 0.10.0
libtpu: 0.0.40
codegen_flags: <defaults>
</compile_context>

<pallas_src>
import functools
import math

import jax
import jax.numpy as jnp
from jax.experimental import pallas as pl
from jax.experimental.pallas import tpu as pltpu


def _round_up(x, m):
    return ((x + m - 1) // m) * m


def _choose_tk(kp, requested):
    """Largest multiple of 128 that divides kp and is <= requested (>=128)."""
    cap = min(_round_up(max(requested, 128), 128), kp)
    best = 128
    for d in range(128, cap + 1, 128):
        if kp % d == 0:
            best = d
    return best


# --------------------------------------------------------------------------
# Single-block kernels (grid=()): whole tiny problem in one VMEM tile.
# --------------------------------------------------------------------------
def _single_block_bias_kernel(x_ref, w_ref, b_ref, o_ref):
    acc = jnp.dot(x_ref[...], w_ref[...], preferred_element_type=jnp.float32)
    o_ref[...] = (acc + b_ref[...]).astype(o_ref.dtype)


def _single_block_kernel(x_ref, w_ref, o_ref):
    o_ref[...] = jnp.dot(
        x_ref[...], w_ref[...], preferred_element_type=jnp.float32
    ).astype(o_ref.dtype)


# --------------------------------------------------------------------------
# Tiled kernels: grid = (ceil(M/tm), ceil(N/tn), Kp/tk), reduction axis last.
# The output block index_map ignores k, so the f32 output block stays resident
# in VMEM across the reduction and we accumulate directly into it.  Bias is
# folded in by initializing the accumulator at k == 0.
# Weight arrives pre-transposed as [Kp, N] so the dot is x[tm,tk] @ w[tk,tn].
# --------------------------------------------------------------------------
def _tiled_bias_kernel(x_ref, w_ref, b_ref, o_ref):
    @pl.when(pl.program_id(2) == 0)
    def _():
        o_ref[...] = jnp.broadcast_to(b_ref[...], o_ref.shape).astype(o_ref.dtype)

    o_ref[...] += jnp.dot(x_ref[...], w_ref[...],
                          preferred_element_type=jnp.float32)


def _tiled_kernel(x_ref, w_ref, o_ref):
    @pl.when(pl.program_id(2) == 0)
    def _():
        o_ref[...] = jnp.zeros_like(o_ref)

    o_ref[...] += jnp.dot(x_ref[...], w_ref[...],
                          preferred_element_type=jnp.float32)


@functools.partial(jax.jit,
                   static_argnames=("tm", "tn", "tk", "compute_dtype"))
def numba_linear_forward(x, weight, bias=None, *, tm=512, tn=1024, tk=512,
                         compute_dtype=jnp.bfloat16):
    """y = x @ weight.T + bias   (PyTorch nn.Linear / NumbaLinear semantics).

    x:      [M, K]  float32
    weight: [N, K]  float32  (out_features, in_features)
    bias:   [N]     float32 or None
    compute_dtype: jnp.bfloat16 (MXU-native, AMP-style) or jnp.float32.
    Accumulation is always float32; output is float32 [M, N].
    """
    M, K = x.shape
    N, Kw = weight.shape
    assert K == Kw, "in_features mismatch"

    is_bf16 = compute_dtype == jnp.bfloat16
    sub = 16 if is_bf16 else 8          # sublane multiple for the compute dtype
    dsize = 2 if is_bf16 else 4

    xc = x.astype(compute_dtype)
    wT = weight.T.astype(compute_dtype)          # one-time [K, N] copy, amortized
    b2 = None if bias is None else bias.astype(jnp.float32).reshape(1, N)

    # ---- Fast path: tiny problems only, so medium shapes keep a parallel
    # grid (important for v7x megacore).  One block, no grid, no padding.
    if M <= 128 and N <= 128 and K <= 4096:
        if b2 is None:
            return pl.pallas_call(
                _single_block_kernel,
                out_shape=jax.ShapeDtypeStruct((M, N), jnp.float32),
            )(xc, wT)
        return pl.pallas_call(
            _single_block_bias_kernel,
            out_shape=jax.ShapeDtypeStruct((M, N), jnp.float32),
        )(xc, wT, b2)

    # ---- Tiled path.
    # Pad ONLY K (zeros don't change x @ W.T).  M/N edge blocks are handled by
    # Pallas clipped writeback: garbage rows/cols from partial input blocks
    # only land in clipped output regions.
    Kp = _round_up(K, 128)
    tk = _choose_tk(Kp, tk)                      # tk divides Kp, no extra K waste
    tm = max(sub, min(_round_up(tm, sub), _round_up(M, sub)))
    tn = max(128, min(_round_up(tn, 128), _round_up(N, 128)))

    if Kp != K:
        xc = jnp.pad(xc, ((0, 0), (0, Kp - K)))
        wT = jnp.pad(wT, ((0, Kp - K), (0, 0)))

    gm, gn, gk = pl.cdiv(M, tm), pl.cdiv(N, tn), Kp // tk
    grid = (gm, gn, gk)

    x_spec = pl.BlockSpec((tm, tk), lambda i, j, k: (i, k))
    w_spec = pl.BlockSpec((tk, tn), lambda i, j, k: (k, j))
    o_spec = pl.BlockSpec((tm, tn), lambda i, j, k: (i, j))

    compiler_params = pltpu.CompilerParams(
        dimension_semantics=("parallel", "parallel", "arbitrary"),
        vmem_limit_bytes=48 * 1024 * 1024,   # safe on v7x (64 MiB) and below
    )
    bytes_accessed = (M * Kp * dsize * gn          # x streamed once per N-tile
                      + Kp * N * dsize * gm        # W streamed once per M-tile
                      + M * N * 4                  # output written once
                      + (0 if b2 is None else N * 4 * gm))
    cost = pl.CostEstimate(flops=2 * M * N * Kp, transcendentals=0,
                           bytes_accessed=bytes_accessed)

    if b2 is None:
        return pl.pallas_call(
            _tiled_kernel,
            out_shape=jax.ShapeDtypeStruct((M, N), jnp.float32),
            grid_spec=pltpu.PrefetchScalarGridSpec(
                num_scalar_prefetch=0,
                grid=grid,
                in_specs=[x_spec, w_spec],
                out_specs=o_spec,
            ),
            compiler_params=compiler_params,
            cost_estimate=cost,
        )(xc, wT)

    b_spec = pl.BlockSpec((1, tn), lambda i, j, k: (0, j))
    return pl.pallas_call(
        _tiled_bias_kernel,
        out_shape=jax.ShapeDtypeStruct((M, N), jnp.float32),
        grid_spec=pltpu.PrefetchScalarGridSpec(
            num_scalar_prefetch=0,
            grid=grid,
            in_specs=[x_spec, w_spec, b_spec],
            out_specs=o_spec,
        ),
        compiler_params=compiler_params,
        cost_estimate=cost,
    )(xc, wT, b2)


def init_numba_linear_params(key, in_features, out_features, use_bias=True):
    """Deterministic re-implementation of NumbaLinear._reset_parameters.

    kaiming_uniform_(a=sqrt(5)) on a [out, in] weight ->
    U(-1/sqrt(fan_in), 1/sqrt(fan_in)); bias -> same bound.
    """
    kw, kb = jax.random.split(key)
    bound = 1.0 / math.sqrt(in_features)
    weight = jax.random.uniform(
        kw, (out_features, in_features), jnp.float32, -bound, bound
    )
    bias = None
    if use_bias:
        bias = jax.random.uniform(kb, (out_features,), jnp.float32, -bound, bound)
    return weight, bias


# TODO(synk): backward pass (grad_input/grad_weight/grad_bias) of
# NumbaLinearFunction is not implemented; forward only.

if __name__ == "__main__":
    key = jax.random.PRNGKey(0)
    k_x, k_p, k_x2, k_p2 = jax.random.split(key, 4)

    # --- small demo matching the module (batch=8, in_features=32, out=16) ---
    batch, in_features, out_features = 8, 32, 16
    x = jax.random.normal(k_x, (batch, in_features), dtype=jnp.float32)
    weight, bias = init_numba_linear_params(k_p, in_features, out_features, True)
    y_ref = x @ weight.T + bias[None, :]

    # full-f32 path (exact nn.Linear semantics)
    y_f32 = jax.block_until_ready(
        numba_linear_forward(x, weight, bias, compute_dtype=jnp.float32))
    assert y_f32.shape == (batch, out_features)
    assert jnp.allclose(y_f32, y_ref, atol=2e-3, rtol=2e-3), "f32 fast path mismatch"

    # default bf16 MXU path (AMP-equivalent numerics)
    y_bf16 = jax.block_until_ready(numba_linear_forward(x, weight, bias))
    assert jnp.allclose(y_bf16, y_ref, atol=3e-2, rtol=3e-2), "bf16 fast path mismatch"

    # --- exercise the tiled / partial-edge-block multi-block path ---
    M2, K2, N2 = 160, 200, 130
    x2 = jax.random.normal(k_x2, (M2, K2), dtype=jnp.float32)
    w2, b2 = init_numba_linear_params(k_p2, K2, N2, True)
    ref2 = x2 @ w2.T + b2[None, :]

    y2 = jax.block_until_ready(
        numba_linear_forward(x2, w2, b2, tm=64, tn=128, tk=128,
                             compute_dtype=jnp.float32))
    assert y2.shape == (M2, N2)
    assert jnp.allclose(y2, ref2, atol=2e-3, rtol=2e-3), "tiled f32 bias path mismatch"

    y3 = jax.block_until_ready(
        numba_linear_forward(x2, w2, None, tm=64, tn=128, tk=128))
    assert jnp.allclose(y3, x2 @ w2.T, atol=3e-2, rtol=3e-2), \
        "tiled bf16 no-bias path mismatch"

    print("KERNEL_OK")
</pallas_src>

<mosaic_0001>
module attributes {stable_mosaic.version = 11 : i64} {
  func.func @_single_block_bias_kernel(%arg0: memref<8x32xf32, #tpu.memory_space<vmem>>, %arg1: memref<32x16xf32, #tpu.memory_space<vmem>>, %arg2: memref<1x16xf32, #tpu.memory_space<vmem>>, %arg3: memref<8x16xf32, #tpu.memory_space<vmem>>) attributes {dimension_semantics = [], scalar_prefetch = 0 : i64, scratch_operands = 0 : i64, tpu.core_type = #tpu.core_type<tc>} {
    %c0 = arith.constant 0 : index
    %c0_0 = arith.constant 0 : index
    %0 = vector.load %arg0[%c0, %c0_0] : memref<8x32xf32, #tpu.memory_space<vmem>>, vector<8x32xf32>
    %c0_1 = arith.constant 0 : index
    %c0_2 = arith.constant 0 : index
    %1 = vector.load %arg1[%c0_1, %c0_2] : memref<32x16xf32, #tpu.memory_space<vmem>>, vector<32x16xf32>
    %cst = arith.constant dense<0.000000e+00> : vector<8x16xf32>
    %2 = tpu.matmul %0, %1, %cst {dimension_numbers = #tpu.dot_dimension_numbers<[1], [0], [0], [1], [0, 0, 1, 1], [], []>} : vector<8x32xf32>, vector<32x16xf32>, vector<8x16xf32> -> vector<8x16xf32>
    %c0_3 = arith.constant 0 : index
    %c0_4 = arith.constant 0 : index
    %3 = vector.load %arg2[%c0_3, %c0_4] : memref<1x16xf32, #tpu.memory_space<vmem>>, vector<1x16xf32>
    %4 = vector.broadcast %3 : vector<1x16xf32> to vector<8x16xf32>
    %5 = arith.addf %2, %4 : vector<8x16xf32>
    %c0_5 = arith.constant 0 : index
    %c0_6 = arith.constant 0 : index
    %6 = vector.load %arg3[%c0_5, %c0_6] : memref<8x16xf32, #tpu.memory_space<vmem>>, vector<8x16xf32>
    tpu.vector_store %arg3[%c0_5, %c0_6], %5 {strides = array<i32>} : memref<8x16xf32, #tpu.memory_space<vmem>>, vector<8x16xf32>,
    return
  }
}

</mosaic_0001>

<bundles_post_ra>
// kernel: numba_linear_forward.1
= control target key start
LH: loop header
LB: loop body
LE: loop exit
PB: predicated region body
PF: predicated region fallthrough
CT: control target
= control target key end

     0   :  { %v169_v3 = vmov 0.0|0.0   ;;  %vm170_vm0 = vmmov 0   ;;  %v171_v6 = vmov 0.0   ;;  %s223_s0 = inlined_call_operand.vmem [shape: f32[8,32], index: 0, kind: input, shape index: {}]   ;;  %s224_s1 = inlined_call_operand.vmem [shape: f32[32,16], index: 1, kind: input, shape index: {}]   ;;  %s225_s2 = inlined_call_operand.vmem [shape: f32[1,16], index: 2, kind: input, shape index: {}]   ;;  %s226_s3 = inlined_call_operand.hbm [shape: f32[8,16], index: 3, kind: output, shape index: {}]  }
   0x1   :  { %v16_v0 = vld [vmem:[%s224_s1] sm:$0xff]  ;;  %v17_v1 = vld [vmem:[%s224_s1 + $0x8] sm:$0xff]  ;;  %v18_v2 = vld [vmem:[%s224_s1 + $0x10] sm:$0xff]  ;;  %135 = vmatprep.subr.bf16.mxu0 %v169_v3  ;;  %132 = vmatprep.mubr.msk.f32.mxu0 %vm170_vm0, %v171_v6 }
   0x2   :  { %v136_v4 = vpack.c.bf16 %v17_v1, %v16_v0  ;;  %v19_v5 = vld [vmem:[%s224_s1 + $0x18] sm:$0xff] }
   0x3   :  { %8 = vsyncpa [#allocation3], 0  ;;  %v139_v7 = vpack.c.bf16 %v19_v5, %v18_v2  ;;  %v15_v8 = vld [vmem:[%s223_s0] sm:$0xff]  ;;  %vm27_vm1 = vcmask 261120   ;;  %s172_s24 = smov [#allocation2]   ;;  %vm101_vm2 = vcmask 130048  }
   0x4   :  { %137 = vmatpush3.bf16.msra.mxu0 %v136_v4  ;;  %v117_v9 = vld [vmem:[%s225_s2] ss:$0 sm:$0xff]  ;;  %s109_s1 = sshll.u32 %s172_s24, 4  ;;  %s110_s1 = int_to_ptr.vmem [resolvable:$true] %s109_s1 }
   0x5   :  { %138 = vmatprep.subr.bf16.mxu0 %v169_v3  ;;  %s145_s25 = scalar_lea.vmem %s110_s1, 128  ;;  %p150_p1 = scmp.lt.s32.totalorder %s110_s1, %s110_s1 }
   0x6   :  { %p146_p0 = scmp.ne.s32.totalorder %s110_s1, %s145_s25  ;;  %p151_p2 = scmp.lt.s32.totalorder %s145_s25, %s145_s25 }
   0x8   :  { %140 = vmatpush3.bf16.msra.mxu0 %v139_v7  ;;  %p152_p3 = por %p151_p2, %p150_p1 }
   0xa   :  { %p153_p4 = pnand %p152_p3, %p146_p0 }
   0xb   :  { %133 = vmatmul.mubr.msk.f32.vlgmr.msra.gmra.mrb[0].mxu0 %vm27_vm1, %v15_v8 }
  0xde   :  { %v97_v10 = vpop.f32.mrb[0].mxu0 }
  0xdf   :  { %v98_v11 = vadd.f32 %v117_v9, %v97_v10  ;;  %v134_v12 = vpop.f32.mrb[1].mxu0 }
  0xe1   :  { %102 = vst.msk [vmem:[#allocation2] sm:$0xff] %vm101_vm2, %v98_v11 }
  0xe2   :  { %156 = shalt.err (!%p153_p4)
}
  0xe3   :  { %s157_s27 = scalar_lea.hbm %s226_s3, 128 }
  0xe4   :  { %p158_p5 = scmp.ne.s32.totalorder %s226_s3, %s157_s27  ;;  %p161_p6 = scmp.lt.u32.totalorder %s157_s27, %s226_s3 }
  0xe6   :  { %p163_p7 = pnand %p161_p6, %p158_p5 }
  0xe8   :  { %166 = shalt.err (!%p163_p7)
}
  0xe9   :  { %112 = dma.vmem_to_hbm [thread:$0]  %s110_s1, 128, %s226_s3, [#allocation3]  }
  0xea   :  { %167 = dma.done.wait [#allocation3], 128  }
  0xeb   :  { %168 = vsyncadd [#allocation3], 4294967168 }
  0xec   :  { %116 = vsyncpa [#allocation3], 1 }

</bundles_post_ra>
